<compile_context>
chip_gen: v7x
topology: tpu7x:2x2x1
jax: 0.10.0
libtpu: 0.0.40
codegen_flags: <defaults>
</compile_context>

<pallas_src>
import jax
import jax.numpy as jnp
from jax.experimental import pallas as pl
from jax.experimental.pallas import tpu as pltpu


def _round_up(x: int, m: int) -> int:
    return ((x + m - 1) // m) * m


# PTDeep takes the activation as a constructor arg; map common choices by name.
_ACTIVATIONS = {
    "relu": lambda h: jnp.maximum(h, 0.0),
    "tanh": jnp.tanh,
    "sigmoid": jax.nn.sigmoid,
    "identity": lambda h: h,
}

_NEG_BIG = -1e30  # effectively -inf for the padded-class mask


def make_ptdeep_kernel(num_layers: int, d_out: int, d_out_pad: int,
                       activation: str = "relu"):
    """Fused kernel: L x (bf16 matmul + f32 bias [+ act]) -> masked softmax."""
    act = _ACTIVATIONS[activation]

    def kernel(*refs):
        # refs = (x_ref, bias_pack_ref, W0, W1, ..., W_{L-1}, out_ref)
        x_ref = refs[0]
        b_ref = refs[1]
        w_refs = refs[2:2 + num_layers]
        out_ref = refs[-1]

        b_all = b_ref[...]                   # (L, max_pad) f32, VMEM-resident
        h = x_ref[...]                       # (TM, d_in) bf16 -- no f32 round trip

        for i in range(num_layers):
            w = w_refs[i][...]               # (K_i, D_{i+1}_pad) bf16
            b = b_all[i:i + 1, :w.shape[1]]  # (1, D_{i+1}_pad) f32
            # MXU in bf16, accumulate in f32; elementwise stays f32 (v5e-safe).
            h = jnp.dot(h.astype(jnp.bfloat16), w,
                        preferred_element_type=jnp.float32) + b
            if i < num_layers - 1:
                h = act(h)

        # Mask padded class columns so they vanish from the softmax (exact).
        if d_out != d_out_pad:
            col = jax.lax.broadcasted_iota(jnp.int32, h.shape, 1)
            h = jnp.where(col < d_out, h, _NEG_BIG)

        # Numerically stable softmax over dim=1 (class axis); exact divide for
        # parity with torch.softmax (cost is negligible: kernel is mem-bound).
        m = jnp.max(h, axis=-1, keepdims=True)
        e = jnp.exp(h - m)
        denom = jnp.sum(e, axis=-1, keepdims=True)
        out_ref[...] = (e / denom).astype(out_ref.dtype)

    return kernel


def ptdeep_forward(x, weights, biases, *, activation: str = "relu",
                   block_rows: int = 1024):
    """Pallas-backed PTDeep.forward.

    x:       (N, layers[0]) float32
    weights: list of (layers[i], layers[i+1]) float32
    biases:  list of (layers[i+1],) float32
    returns: (N, layers[-1]) float32 softmax probabilities
    """
    num_layers = len(weights)
    n, d_in = x.shape
    dims = [d_in] + [int(w.shape[1]) for w in weights]
    # Input feature dim stays UNPADDED in HBM; hidden/output dims pad to 128.
    dims_pad = [d_in] + [_round_up(d, 128) for d in dims[1:]]
    d_out, d_out_pad = dims[-1], dims_pad[-1]
    max_pad = max(dims_pad[1:])

    # Balanced batch tiles: avoid a mostly-padding last tile, amortize the
    # per-grid-step pipeline overhead, and keep >=2 grid steps (v7x megacore)
    # whenever N allows.  tm is a multiple of 16 (bf16 sublane packing).
    target_tiles = max(pl.cdiv(n, block_rows), 2)
    tm = _round_up(pl.cdiv(n, target_tiles), 16)
    n_pad = _round_up(n, tm)
    grid = (n_pad // tm,)

    # x: bf16, feature dim unpadded; only pad batch rows when necessary.
    x_bf = x.astype(jnp.bfloat16)
    if n_pad == n:
        x_p = x_bf
    else:
        x_p = jnp.zeros((n_pad, d_in), jnp.bfloat16).at[:n, :].set(x_bf)

    # Weights: zero-pad to lane-dense widths (exact, since padded rows/cols
    # and padded bias entries are zero).  First layer keeps K = d_in unpadded.
    w_p = []
    for i, w in enumerate(weights):
        wp = jnp.zeros((dims_pad[i], dims_pad[i + 1]), jnp.bfloat16)
        wp = wp.at[:dims[i], :dims[i + 1]].set(w.astype(jnp.bfloat16))
        w_p.append(wp)

    # Per-layer biases packed into one (L, max_pad) f32 operand.
    b_p = jnp.zeros((num_layers, max_pad), jnp.float32)
    for i, b in enumerate(biases):
        b_p = b_p.at[i, :dims[i + 1]].set(b.astype(jnp.float32))

    kernel = make_ptdeep_kernel(num_layers, d_out, d_out_pad, activation)

    in_specs = [
        pl.BlockSpec((tm, d_in), lambda i: (i, 0)),             # x tile (pipelined)
        pl.BlockSpec((num_layers, max_pad), lambda i: (0, 0)),  # biases (resident)
    ]
    for li in range(num_layers):                                 # weights (resident)
        in_specs.append(
            pl.BlockSpec((dims_pad[li], dims_pad[li + 1]), lambda i: (0, 0)))
    out_spec = pl.BlockSpec((tm, d_out_pad), lambda i: (i, 0))   # lane-dense out

    # Explicit VMEM budget: double-buffered x/out tiles + resident weights +
    # bias pack, with headroom for f32 intermediates and compiler scratch.
    w_bytes = 2 * sum(dims_pad[i] * dims_pad[i + 1] for i in range(num_layers))
    buf_bytes = (2 * tm * d_in * 2            # x tiles, bf16, double-buffered
                 + 2 * tm * d_out_pad * 4     # out tiles, f32, double-buffered
                 + 2 * w_bytes                # resident weights (default 2 bufs)
                 + 2 * num_layers * max_pad * 4)
    vmem_limit = int(min(max(2 * buf_bytes + (8 << 20), 16 << 20), 48 << 20))

    mm_flops = 2 * n_pad * sum(dims_pad[i] * dims_pad[i + 1]
                               for i in range(num_layers))
    bytes_acc = (2 * n_pad * d_in            # bf16 input stream
                 + 4 * n_pad * d_out_pad     # f32 output stream
                 + w_bytes
                 + 4 * num_layers * max_pad)
    cost = pl.CostEstimate(flops=mm_flops,
                           transcendentals=n_pad * d_out_pad,
                           bytes_accessed=bytes_acc)

    out_p = pl.pallas_call(
        kernel,
        out_shape=jax.ShapeDtypeStruct((n_pad, d_out_pad), jnp.float32),
        grid_spec=pltpu.PrefetchScalarGridSpec(
            num_scalar_prefetch=0,
            grid=grid,
            in_specs=in_specs,
            out_specs=out_spec,
        ),
        compiler_params=pltpu.CompilerParams(
            dimension_semantics=("parallel",),
            vmem_limit_bytes=vmem_limit),
        cost_estimate=cost,
    )(x_p, b_p, *w_p)

    return out_p[:n, :d_out]


def ptdeep_reference(x, weights, biases, activation: str = "relu"):
    """Pure-JAX reference mirroring the kernel's precision (bf16 matmul, f32 acc)."""
    act = _ACTIVATIONS[activation]
    h = x
    for i, (w, b) in enumerate(zip(weights, biases)):
        h = jnp.dot(h.astype(jnp.bfloat16), w.astype(jnp.bfloat16),
                    preferred_element_type=jnp.float32) + b.astype(jnp.float32)
        if i < len(weights) - 1:
            h = act(h)
    return jax.nn.softmax(h, axis=1)


if __name__ == "__main__":
    # Module config: layers = [16, 32, 32, 10], activation = ReLU (torch.relu)
    layers = [16, 32, 32, 10]
    batch = 8

    key = jax.random.PRNGKey(0)
    key, kx = jax.random.split(key)
    x = jax.random.normal(kx, (batch, layers[0]), dtype=jnp.float32)

    # Deterministic parameter init mirroring PTDeep.__init__:
    #   W_i ~ randn(layers[i], layers[i+1]),  b_i = zeros(layers[i+1])
    weights, biases = [], []
    for i in range(len(layers) - 1):
        key, kw = jax.random.split(key)
        weights.append(jax.random.normal(
            kw, (layers[i], layers[i + 1]), dtype=jnp.float32))
        biases.append(jnp.zeros((layers[i + 1],), dtype=jnp.float32))

    out = ptdeep_forward(x, weights, biases, activation="relu")
    out = jax.block_until_ready(out)

    ref = ptdeep_reference(x, weights, biases, activation="relu")
    assert out.shape == (batch, layers[-1])
    # bf16 MXU matmul is mirrored in the reference; softmax divide is exact.
    assert jnp.allclose(out, ref, atol=1e-4, rtol=1e-4), "mismatch vs reference"
    assert jnp.allclose(jnp.sum(out, axis=1), 1.0, atol=1e-4)

    print("KERNEL_OK")
</pallas_src>

<mosaic_0001>
module attributes {stable_mosaic.version = 11 : i64} {
  func.func @kernel(%arg0: i32, %arg1: memref<16x16xbf16, #tpu.memory_space<vmem>>, %arg2: memref<3x128xf32, #tpu.memory_space<vmem>>, %arg3: memref<16x128xbf16, #tpu.memory_space<vmem>>, %arg4: memref<128x128xbf16, #tpu.memory_space<vmem>>, %arg5: memref<128x128xbf16, #tpu.memory_space<vmem>>, %arg6: memref<16x128xf32, #tpu.memory_space<vmem>>) attributes {dimension_semantics = [#tpu.dimension_semantics<parallel>], iteration_bounds = array<i64: 1>, scalar_prefetch = 0 : i64, scratch_operands = 0 : i64, tpu.core_type = #tpu.core_type<tc>, window_params = [{transform_indices = @transform_0, window_bounds = array<i64: 16, 16>}, {pipeline_mode = #tpu.pipeline_mode<synchronous>, transform_indices = @transform_1, window_bounds = array<i64: 3, 128>}, {pipeline_mode = #tpu.pipeline_mode<synchronous>, transform_indices = @transform_2, window_bounds = array<i64: 16, 128>}, {pipeline_mode = #tpu.pipeline_mode<synchronous>, transform_indices = @transform_3, window_bounds = array<i64: 128, 128>}, {pipeline_mode = #tpu.pipeline_mode<synchronous>, transform_indices = @transform_4, window_bounds = array<i64: 128, 128>}, {transform_indices = @transform_5, window_bounds = array<i64: 16, 128>}]} {
    %c0 = arith.constant 0 : index
    %c0_0 = arith.constant 0 : index
    %0 = vector.load %arg2[%c0, %c0_0] : memref<3x128xf32, #tpu.memory_space<vmem>>, vector<3x128xf32>
    %c0_1 = arith.constant 0 : index
    %c0_2 = arith.constant 0 : index
    %1 = vector.load %arg1[%c0_1, %c0_2] : memref<16x16xbf16, #tpu.memory_space<vmem>>, vector<16x16xbf16>
    %c0_3 = arith.constant 0 : index
    %c0_4 = arith.constant 0 : index
    %2 = vector.load %arg3[%c0_3, %c0_4] : memref<16x128xbf16, #tpu.memory_space<vmem>>, vector<16x128xbf16>
    %3 = vector.extract_strided_slice %0 {offsets = [0, 0], sizes = [1, 128], strides = [1, 1]} : vector<3x128xf32> to vector<1x128xf32>
    %cst = arith.constant dense<0.000000e+00> : vector<16x128xf32>
    %4 = tpu.matmul %1, %2, %cst {dimension_numbers = #tpu.dot_dimension_numbers<[1], [0], [0], [1], [0, 0, 1, 1], [], []>} : vector<16x16xbf16>, vector<16x128xbf16>, vector<16x128xf32> -> vector<16x128xf32>
    %5 = vector.broadcast %3 : vector<1x128xf32> to vector<16x128xf32>
    %6 = arith.addf %4, %5 : vector<16x128xf32>
    %cst_5 = arith.constant 0.000000e+00 : f32
    %7 = vector.broadcast %cst_5 : f32 to vector<16x128xf32>
    %8 = arith.maximumf %6, %7 : vector<16x128xf32>
    %c0_6 = arith.constant 0 : index
    %c0_7 = arith.constant 0 : index
    %9 = vector.load %arg4[%c0_6, %c0_7] : memref<128x128xbf16, #tpu.memory_space<vmem>>, vector<128x128xbf16>
    %10 = vector.extract_strided_slice %0 {offsets = [1, 0], sizes = [1, 128], strides = [1, 1]} : vector<3x128xf32> to vector<1x128xf32>
    %11 = arith.truncf %8 : vector<16x128xf32> to vector<16x128xbf16>
    %cst_8 = arith.constant dense<0.000000e+00> : vector<16x128xf32>
    %12 = tpu.matmul %11, %9, %cst_8 {dimension_numbers = #tpu.dot_dimension_numbers<[1], [0], [0], [1], [0, 0, 1, 1], [], []>} : vector<16x128xbf16>, vector<128x128xbf16>, vector<16x128xf32> -> vector<16x128xf32>
    %13 = vector.broadcast %10 : vector<1x128xf32> to vector<16x128xf32>
    %14 = arith.addf %12, %13 : vector<16x128xf32>
    %cst_9 = arith.constant 0.000000e+00 : f32
    %15 = vector.broadcast %cst_9 : f32 to vector<16x128xf32>
    %16 = arith.maximumf %14, %15 : vector<16x128xf32>
    %c0_10 = arith.constant 0 : index
    %c0_11 = arith.constant 0 : index
    %17 = vector.load %arg5[%c0_10, %c0_11] : memref<128x128xbf16, #tpu.memory_space<vmem>>, vector<128x128xbf16>
    %18 = vector.extract_strided_slice %0 {offsets = [2, 0], sizes = [1, 128], strides = [1, 1]} : vector<3x128xf32> to vector<1x128xf32>
    %19 = arith.truncf %16 : vector<16x128xf32> to vector<16x128xbf16>
    %cst_12 = arith.constant dense<0.000000e+00> : vector<16x128xf32>
    %20 = tpu.matmul %19, %17, %cst_12 {dimension_numbers = #tpu.dot_dimension_numbers<[1], [0], [0], [1], [0, 0, 1, 1], [], []>} : vector<16x128xbf16>, vector<128x128xbf16>, vector<16x128xf32> -> vector<16x128xf32>
    %21 = vector.broadcast %18 : vector<1x128xf32> to vector<16x128xf32>
    %22 = arith.addf %20, %21 : vector<16x128xf32>
    %23 = tpu.iota {dimensions = array<i32: 1>} : vector<16x128xi32>
    %c10_i32 = arith.constant 10 : i32
    %24 = vector.broadcast %c10_i32 : i32 to vector<16x128xi32>
    %25 = arith.cmpi slt, %23, %24 : vector<16x128xi32>
    %cst_13 = arith.constant -1.000000e+30 : f32
    %26 = vector.broadcast %cst_13 : f32 to vector<16x128xf32>
    %27 = arith.select %25, %22, %26 : vector<16x128xi1>, vector<16x128xf32>
    %cst_14 = arith.constant dense<0xFF800000> : vector<16xf32>
    %28 = vector.multi_reduction <maximumf>, %27, %cst_14 [1] : vector<16x128xf32> to vector<16xf32>
    %29 = vector.shape_cast %28 : vector<16xf32> to vector<16x1xf32>
    %30 = vector.broadcast %29 : vector<16x1xf32> to vector<16x128xf32>
    %31 = arith.subf %27, %30 : vector<16x128xf32>
    %32 = math.exp %31 : vector<16x128xf32>
    %cst_15 = arith.constant dense<0.000000e+00> : vector<16xf32>
    %33 = vector.multi_reduction <add>, %32, %cst_15 [1] : vector<16x128xf32> to vector<16xf32>
    %34 = vector.shape_cast %33 : vector<16xf32> to vector<16x1xf32>
    %35 = vector.broadcast %34 : vector<16x1xf32> to vector<16x128xf32>
    %36 = arith.divf %32, %35 : vector<16x128xf32>
    %c0_16 = arith.constant 0 : index
    %c0_17 = arith.constant 0 : index
    %37 = vector.load %arg6[%c0_16, %c0_17] : memref<16x128xf32, #tpu.memory_space<vmem>>, vector<16x128xf32>
    tpu.vector_store %arg6[%c0_16, %c0_17], %36 {strides = array<i32>} : memref<16x128xf32, #tpu.memory_space<vmem>>, vector<16x128xf32>,
    return
  }
  func.func @transform_0(%arg0: i32) -> (i32, i32) {
    %c0_i32 = arith.constant 0 : i32
    %c0_i32_0 = arith.constant 0 : i32
    return %arg0, %c0_i32 : i32, i32
  }
  func.func @transform_1(%arg0: i32) -> (i32, i32) {
    %c0_i32 = arith.constant 0 : i32
    %c0_i32_0 = arith.constant 0 : i32
    %c0_i32_1 = arith.constant 0 : i32
    return %c0_i32, %c0_i32_0 : i32, i32
  }
  func.func @transform_2(%arg0: i32) -> (i32, i32) {
    %c0_i32 = arith.constant 0 : i32
    %c0_i32_0 = arith.constant 0 : i32
    %c0_i32_1 = arith.constant 0 : i32
    return %c0_i32, %c0_i32_0 : i32, i32
  }
  func.func @transform_3(%arg0: i32) -> (i32, i32) {
    %c0_i32 = arith.constant 0 : i32
    %c0_i32_0 = arith.constant 0 : i32
    %c0_i32_1 = arith.constant 0 : i32
    return %c0_i32, %c0_i32_0 : i32, i32
  }
  func.func @transform_4(%arg0: i32) -> (i32, i32) {
    %c0_i32 = arith.constant 0 : i32
    %c0_i32_0 = arith.constant 0 : i32
    %c0_i32_1 = arith.constant 0 : i32
    return %c0_i32, %c0_i32_0 : i32, i32
  }
  func.func @transform_5(%arg0: i32) -> (i32, i32) {
    %c0_i32 = arith.constant 0 : i32
    %c0_i32_0 = arith.constant 0 : i32
    return %arg0, %c0_i32 : i32, i32
  }
}

</mosaic_0001>

<bundles_post_ra>
// kernel: tpu_custom_call.1
= control target key start
LH: loop header
LB: loop body
LE: loop exit
PB: predicated region body
PF: predicated region fallthrough
CT: control target
= control target key end

     0   :  { %10 = vsyncpa [#allocation3], 0  ;;  %s830_s0 = inlined_call_operand.hbm [shape: bf16[16,16], index: 0, kind: input, shape index: {}]   ;;  %s831_s1 = inlined_call_operand.hbm [shape: f32[3,128], index: 1, kind: input, shape index: {}]   ;;  %s832_s2 = inlined_call_operand.hbm [shape: bf16[16,128], index: 2, kind: input, shape index: {}]   ;;  %s833_s3 = inlined_call_operand.hbm [shape: bf16[128,128], index: 3, kind: input, shape index: {}]   ;;  %s834_s4 = inlined_call_operand.hbm [shape: bf16[128,128], index: 4, kind: input, shape index: {}]   ;;  %s835_s5 = inlined_call_operand.hbm [shape: f32[16,128], index: 5, kind: output, shape index: {}]  }
   0x1   :  { %11 = vsyncpa [#allocation6], 0 }
   0x2   :  { %12 = vsyncpa [#allocation9], 0 }
   0x3   :  { %13 = vsyncpa [#allocation4], 0  ;;  %s684_s18 = smov [#allocation5]   ;;  %s544_s22 = scalar_lea.hbm %s831_s1, 64 }
   0x4   :  { %s32_s19 = sshll.u32 %s684_s18, 4  ;;  %p545_p0 = scmp.ne.s32.totalorder %s831_s1, %s544_s22  ;;  %s33_s19 = int_to_ptr.vmem [resolvable:$true] %s32_s19 }
   0x5   :  { %p548_p1 = scmp.lt.u32.totalorder %s544_s22, %s831_s1 }
   0x7   :  { %p550_p2 = pnand %p548_p1, %p545_p0 }
   0x9   :  { %553 = shalt.err (!%p550_p2)
}
   0xa   :  { %s554_s27 = scalar_lea.vmem %s33_s19, 64  ;;  %p559_p4 = scmp.lt.s32.totalorder %s33_s19, %s33_s19 }
   0xb   :  { %p555_p3 = scmp.ne.s32.totalorder %s33_s19, %s554_s27  ;;  %p560_p5 = scmp.lt.s32.totalorder %s554_s27, %s554_s27 }
   0xd   :  { %p561_p6 = por %p560_p5, %p559_p4 }
   0xf   :  { %p562_p7 = pnand %p561_p6, %p555_p3 }
  0x11   :  { %565 = shalt.err (!%p562_p7)
}
  0x12   :  { %35 = dma.hbm_to_vmem [thread:$0]  %s831_s1, 64, %s33_s19, [#allocation6]  }
  0x13   :  { %s685_s30 = smov [#allocation8]   ;;  %s686_s7 = smov [#allocation2]  }
  0x14   :  { %s53_s6 = sshll.u32 %s685_s30, 4  ;;  %s19_s8 = sshll.u32 %s686_s7, 4  ;;  %s54_s6 = int_to_ptr.vmem [resolvable:$true] %s53_s6  ;;  %s20_s8 = int_to_ptr.vmem [resolvable:$true] %s19_s8 }
  0x15   :  { %s566_s11 = scalar_lea.hbm %s833_s3, 1024 }
  0x16   :  { %p567_p8 = scmp.ne.s32.totalorder %s833_s3, %s566_s11  ;;  %p570_p9 = scmp.lt.u32.totalorder %s566_s11, %s833_s3 }
  0x18   :  { %p572_p10 = pnand %p570_p9, %p567_p8 }
  0x1a   :  { %575 = shalt.err (!%p572_p10)
}
  0x1b   :  { %s576_s1 = scalar_lea.vmem %s54_s6, 1024  ;;  %p581_p12 = scmp.lt.s32.totalorder %s54_s6, %s54_s6 }
  0x1c   :  { %p577_p11 = scmp.ne.s32.totalorder %s54_s6, %s576_s1  ;;  %p582_p13 = scmp.lt.s32.totalorder %s576_s1, %s576_s1 }
  0x1e   :  { %p583_p0 = por %p582_p13, %p581_p12 }
  0x20   :  { %p584_p1 = pnand %p583_p0, %p577_p11 }
  0x22   :  { %587 = shalt.err (!%p584_p1)
}
  0x23   :  { %s687_s16 = smov 64   ;;  %s688_s17 = smov 4  }
  0x24   :  { %59 = dma.hbm_to_vmem [thread:$0]  %s833_s3, 1024, %s54_s6, [#allocation9], %s687_s16, %s687_s16, %s688_s17  }
  0x25   :  { %s588_s22 = scalar_lea.hbm %s830_s0, 128 }
  0x26   :  { %p589_p2 = scmp.ne.s32.totalorder %s830_s0, %s588_s22  ;;  %p592_p3 = scmp.lt.u32.totalorder %s588_s22, %s830_s0 }
  0x28   :  { %p594_p4 = pnand %p592_p3, %p589_p2 }
  0x2a   :  { %597 = shalt.err (!%p594_p4)
}
  0x2b   :  { %s598_s27 = scalar_lea.vmem %s20_s8, 128  ;;  %p603_p6 = scmp.lt.s32.totalorder %s20_s8, %s20_s8 }
  0x2c   :  { %p599_p5 = scmp.ne.s32.totalorder %s20_s8, %s598_s27  ;;  %p604_p7 = scmp.lt.s32.totalorder %s598_s27, %s598_s27 }
  0x2e   :  { %p605_p8 = por %p604_p7, %p603_p6 }
  0x30   :  { %p606_p9 = pnand %p605_p8, %p599_p5 }
  0x32   :  { %609 = shalt.err (!%p606_p9)
}
  0x33   :  { %25 = dma.hbm_to_vmem [thread:$0]  %s830_s0, 128, %s20_s8, [#allocation3], %s687_s16, %s687_s16, %s688_s17  }
  0x34   :  { %s689_s29 = smov [#allocation7]   ;;  %s690_s6 = smov [#allocation10]  }
  0x35   :  { %s41_s30 = sshll.u32 %s689_s29, 4  ;;  %s65_s7 = sshll.u32 %s690_s6, 4  ;;  %s42_s30 = int_to_ptr.vmem [resolvable:$true] %s41_s30  ;;  %s66_s7 = int_to_ptr.vmem [resolvable:$true] %s65_s7 }
  0x36   :  { %s610_s11 = scalar_lea.hbm %s832_s2, 128 }
  0x37   :  { %p611_p10 = scmp.ne.s32.totalorder %s832_s2, %s610_s11  ;;  %p614_p11 = scmp.lt.u32.totalorder %s610_s11, %s832_s2 }
  0x39   :  { %p616_p12 = pnand %p614_p11, %p611_p10 }
  0x3b   :  { %619 = shalt.err (!%p616_p12)
}
  0x3c   :  { %s620_s0 = scalar_lea.vmem %s42_s30, 128  ;;  %p625_p0 = scmp.lt.s32.totalorder %s42_s30, %s42_s30 }
  0x3d   :  { %p621_p13 = scmp.ne.s32.totalorder %s42_s30, %s620_s0  ;;  %p626_p1 = scmp.lt.s32.totalorder %s620_s0, %s620_s0 }
  0x3f   :  { %p627_p2 = por %p626_p1, %p625_p0 }
  0x41   :  { %p628_p3 = pnand %p627_p2, %p621_p13 }
  0x43   :  { %631 = shalt.err (!%p628_p3)
}
  0x44   :  { %47 = dma.hbm_to_vmem [thread:$0]  %s832_s2, 128, %s42_s30, [#allocation6], %s687_s16, %s687_s16, %s688_s17  }
  0x45   :  { %s632_s20 = scalar_lea.hbm %s834_s4, 1024 }
  0x46   :  { %p633_p4 = scmp.ne.s32.totalorder %s834_s4, %s632_s20  ;;  %p636_p5 = scmp.lt.u32.totalorder %s632_s20, %s834_s4 }
  0x48   :  { %p638_p6 = pnand %p636_p5, %p633_p4 }
  0x4a   :  { %641 = shalt.err (!%p638_p6)
}
  0x4b   :  { %s642_s25 = scalar_lea.vmem %s66_s7, 1024  ;;  %p647_p8 = scmp.lt.s32.totalorder %s66_s7, %s66_s7 }
  0x4c   :  { %p643_p7 = scmp.ne.s32.totalorder %s66_s7, %s642_s25  ;;  %p648_p9 = scmp.lt.s32.totalorder %s642_s25, %s642_s25 }
  0x4e   :  { %p649_p10 = por %p648_p9, %p647_p8 }
  0x50   :  { %p650_p11 = pnand %p649_p10, %p643_p7 }
  0x52   :  { %653 = shalt.err (!%p650_p11)
}
  0x53   :  { %71 = dma.hbm_to_vmem [thread:$0]  %s834_s4, 1024, %s66_s7, [#allocation9], %s687_s16, %s687_s16, %s688_s17  }
  0x54   :  { %676 = dma.done.wait [#allocation3], 128  }
  0x55   :  { %677 = vsyncadd [#allocation3], 4294967168 }
  0x56   :  { %678 = dma.done.wait [#allocation6], 192  }
  0x57   :  { %679 = vsyncadd [#allocation6], 4294967104 }
  0x58   :  { %680 = dma.done.wait [#allocation9], 2048  }
  0x59   :  { %681 = vsyncadd [#allocation9], 4294965248  ;;  %v691_v0 = vmov 0.0   ;;  %vm692_vm0 = vmmov 0   ;;  %v518_v1 = vld [vmem:[#allocation7] sm:$0xff]   ;;  %v519_v2 = vld [vmem:[#allocation2] sm:$0xff]   ;;  %v93_v17 = vlaneseq }
  0x5a   :  { %460 = vmatprep.subr.bf16.mxu0 %v691_v0  ;;  %462 = vmatprep.mubr.msk.bf16.mxu0 %vm692_vm0, %v691_v0  ;;  %vm108_vm1 = vcmask 130048   ;;  %v520_v3 = vld [vmem:[#allocation8] sm:$0xff]   ;;  %v521_v4 = vld [vmem:[#allocation8 + $0x8] sm:$0xff]   ;;  %v522_v5 = vld [vmem:[#allocation8 + $0x10] sm:$0xff]   ;;  %s693_s4 = smov [#allocation11]  }
  0x5b   :  { %466 = vmatprep.subr.bf16.mxu1 %v691_v0  ;;  %482 = vmatprep.mubr.msk.bf16.mxu1 %vm692_vm0, %v691_v0  ;;  %v523_v6 = vld [vmem:[#allocation8 + $0x18] sm:$0xff]   ;;  %v524_v7 = vld [vmem:[#allocation8 + $0x20] sm:$0xff]   ;;  %v525_v8 = vld [vmem:[#allocation8 + $0x28] sm:$0xff]   ;;  %v94_v18 = vshrl.u32 %v93_v17, 7  ;;  %v378_v45 = vand.u32 127, %v93_v17  ;;  %s407_s16 = sshll.u32 %s693_s4, 4  ;;  %s408_s16 = int_to_ptr.vmem [resolvable:$true] %s407_s16 }
  0x5c   :  { %461 = vmatpush3.bf16.msra.mxu0 %v518_v1  ;;  %467 = vmatpush3.bf16.msra.mxu1 %v520_v3  ;;  %v526_v9 = vld [vmem:[#allocation8 + $0x30] sm:$0xff]   ;;  %v527_v10 = vld [vmem:[#allocation8 + $0x38] sm:$0xff]   ;;  %v528_v11 = vld [vmem:[#allocation10] sm:$0xff]   ;;  %s654_s17 = scalar_lea.vmem %s408_s16, 256  ;;  %p659_p13 = scmp.lt.s32.totalorder %s408_s16, %s408_s16 }
  0x5d   :  { %486 = vmatprep.subr.bf16.mxu0 %v691_v0  ;;  %468 = vmatprep.subr.bf16.mxu1 %v691_v0  ;;  %v529_v12 = vld [vmem:[#allocation10 + $0x8] sm:$0xff]   ;;  %v530_v13 = vld [vmem:[#allocation10 + $0x10] sm:$0xff]   ;;  %v531_v14 = vld [vmem:[#allocation10 + $0x18] sm:$0xff]   ;;  %v95_v19 = vsub.s32 0, %v94_v18  ;;  %v174_v33 = vsub.s32 1, %v94_v18  ;;  %v286_v44 = vsub.s32 2, %v94_v18  ;;  %p655_p12 = scmp.ne.s32.totalorder %s408_s16, %s654_s17  ;;  %p660_p0 = scmp.lt.s32.totalorder %s654_s17, %s654_s17 }
  0x5e   :  { %v532_v15 = vld [vmem:[#allocation10 + $0x20] sm:$0xff]   ;;  %v533_v16 = vld [vmem:[#allocation10 + $0x28] sm:$0xff]   ;;  %v88_v20 = vld [vmem:[#allocation5] sm:$0x7]  ;;  %vm379_vm2 = vcmp.lt.s32.totalorder %v378_v45, 10 }
  0x5f   :  { %463 = vmatmul.mubr.msk.bf16.vlgmr.msra.gmra.mrb[0].mxu0 %vm108_vm1, %v519_v2  ;;  %v96_v21 = vrot.slane %v88_v20, %v95_v19  ;;  %v534_v31 = vld [vmem:[#allocation10 + $0x30] sm:$0xff]   ;;  %v535_v32 = vld [vmem:[#allocation10 + $0x38] sm:$0xff]   ;;  %v175_v34 = vrot.slane %v88_v20, %v174_v33  ;;  %v287_v46 = vrot.slane %v88_v20, %v286_v44  ;;  %p661_p1 = por %p660_p0, %p659_p13 }
  0x60   :  { %502 = vmatprep.mubr.msk.bf16.mxu0 %vm692_vm0, %v691_v0  ;;  %469 = vmatpush3.bf16.msra.mxu1 %v521_v4 }
  0x61   :  { %470 = vmatprep.subr.bf16.mxu1 %v691_v0  ;;  %487 = vmatpush3.bf16.msra.mxu0 %v528_v11  ;;  %p662_p2 = pnand %p661_p1, %p655_p12 }
  0x62   :  { %488 = vmatprep.subr.bf16.mxu0 %v691_v0 }
  0x64   :  { %471 = vmatpush3.bf16.msra.mxu1 %v522_v5 }
  0x65   :  { %472 = vmatprep.subr.bf16.mxu1 %v691_v0  ;;  %489 = vmatpush3.bf16.msra.mxu0 %v529_v12 }
  0x66   :  { %490 = vmatprep.subr.bf16.mxu0 %v691_v0 }
  0x68   :  { %473 = vmatpush3.bf16.msra.mxu1 %v523_v6 }
  0x69   :  { %474 = vmatprep.subr.bf16.mxu1 %v691_v0  ;;  %491 = vmatpush3.bf16.msra.mxu0 %v530_v13 }
  0x6a   :  { %492 = vmatprep.subr.bf16.mxu0 %v691_v0 }
  0x6c   :  { %475 = vmatpush3.bf16.msra.mxu1 %v524_v7 }
  0x6d   :  { %476 = vmatprep.subr.bf16.mxu1 %v691_v0  ;;  %493 = vmatpush3.bf16.msra.mxu0 %v531_v14 }
  0x6e   :  { %494 = vmatprep.subr.bf16.mxu0 %v691_v0 }
  0x70   :  { %477 = vmatpush3.bf16.msra.mxu1 %v525_v8 }
  0x71   :  { %478 = vmatprep.subr.bf16.mxu1 %v691_v0  ;;  %495 = vmatpush3.bf16.msra.mxu0 %v532_v15 }
  0x72   :  { %496 = vmatprep.subr.bf16.mxu0 %v691_v0 }
  0x74   :  { %479 = vmatpush3.bf16.msra.mxu1 %v526_v9 }
  0x75   :  { %480 = vmatprep.subr.bf16.mxu1 %v691_v0  ;;  %497 = vmatpush3.bf16.msra.mxu0 %v533_v16 }
  0x76   :  { %498 = vmatprep.subr.bf16.mxu0 %v691_v0 }
  0x78   :  { %481 = vmatpush3.bf16.msra.mxu1 %v527_v10 }
  0x79   :  { %499 = vmatpush3.bf16.msra.mxu0 %v534_v31 }
  0x7a   :  { %500 = vmatprep.subr.bf16.mxu0 %v691_v0 }
  0x7d   :  { %501 = vmatpush3.bf16.msra.mxu0 %v535_v32 }
 0x132   :  { %v146_v22 = vpop.f32.mrb[0].mxu0 }
 0x133   :  { %v147_v23 = vadd.f32 %v146_v22, %v96_v21  ;;  %v464_v24 = vpop.f32.mrb[1].mxu0 }
 0x134   :  { %v149_v25 = vpop.f32.mrb[2].mxu0 }
 0x135   :  { %v150_v26 = vadd.f32 %v149_v25, %v96_v21  ;;  %v465_v27 = vpop.f32.mrb[3].mxu0  ;;  %v153_v28 = vmax.f32 %v147_v23, 0.0 }
 0x137   :  { %v154_v29 = vmax.f32 %v150_v26, 0.0 }
 0x139   :  { %v171_v30 = vpack.c.bf16 %v154_v29, %v153_v28 }
 0x13b   :  { %483 = vmatmul.mubr.bf16.vlgmr.msra.gmra.mrb[0].mxu1 %v171_v30 }
 0x20e   :  { %v258_v35 = vpop.f32.mrb[0].mxu1 }
 0x20f   :  { %v259_v36 = vadd.f32 %v258_v35, %v175_v34  ;;  %v484_v37 = vpop.f32.mrb[1].mxu1 }
 0x210   :  { %v261_v38 = vpop.f32.mrb[2].mxu1 }
 0x211   :  { %v262_v39 = vadd.f32 %v261_v38, %v175_v34  ;;  %v485_v40 = vpop.f32.mrb[3].mxu1  ;;  %v265_v41 = vmax.f32 %v259_v36, 0.0 }
 0x213   :  { %v266_v42 = vmax.f32 %v262_v39, 0.0 }
 0x215   :  { %v283_v43 = vpack.c.bf16 %v266_v42, %v265_v41 }
 0x217   :  { %503 = vmatmul.mubr.bf16.vlgmr.msra.gmra.mrb[4].mxu0 %v283_v43 }
 0x2ea   :  { %v370_v47 = vpop.f32.mrb[4].mxu0 }
 0x2eb   :  { %v371_v48 = vadd.f32 %v370_v47, %v287_v46  ;;  %v504_v49 = vpop.f32.mrb[5].mxu0 }
 0x2ec   :  { %v373_v50 = vpop.f32.mrb[6].mxu0 }
 0x2ed   :  { %v374_v51 = vadd.f32 %v373_v50, %v287_v46  ;;  %v505_v52 = vpop.f32.mrb[7].mxu0  ;;  %v380_v53 = vsel %vm379_vm2, %v371_v48, -1e+30 }
 0x2ee   :  { %382 = vmax.xlane.f32.xlu0 %v380_v53 }
 0x2ef   :  { %v381_v54 = vsel %vm379_vm2, %v374_v51, -1e+30 }
 0x2f2   :  { %384 = vmax.xlane.f32.xlu0 %v381_v54 }
 0x37b   :  { %v383_v55 = vpop.xlane.xlu0 %382 }
 0x37c   :  { %v386_v56 = vsub.f32 %v380_v53, %v383_v55 }
 0x37e   :  { %v388_v57 = vmul.f32 1.442695, %v386_v56 }
 0x37f   :  { %v385_v58 = vpop.xlane.xlu0 %384 }
 0x380   :  { %536 = vpow2.f32 %v388_v57  ;;  %v387_v59 = vsub.f32 %v381_v54, %v385_v58 }
 0x382   :  { %v390_v60 = vmul.f32 1.442695, %v387_v59 }
 0x384   :  { %538 = vpow2.f32 %v390_v60 }
 0x38a   :  { %v537_v61 = vpop.eup %536 }
 0x38b   :  { %392 = vadd.xlane.f32.xlu1 %v537_v61 }
 0x38e   :  { %v539_v62 = vpop.eup %538 }
 0x38f   :  { %394 = vadd.xlane.f32.xlu1 %v539_v62 }
 0x418   :  { %v393_v63 = vpop.xlane.xlu1 %392 }
 0x419   :  { %540 = vrcp.f32 %v393_v63 }
 0x41c   :  { %v395_v0 = vpop.xlane.xlu1 %394 }
 0x41d   :  { %542 = vrcp.f32 %v395_v0 }
 0x423   :  { %v541_v1 = vpop.eup %540 }
 0x424   :  { %v397_v2 = vmul.f32 %v541_v1, %v537_v61 }
 0x426   :  { %400 = vst [vmem:[#allocation11] sm:$0xff] %v397_v2 }
 0x427   :  { %v543_v3 = vpop.eup %542 }
 0x428   :  { %v399_v4 = vmul.f32 %v543_v3, %v539_v62 }
 0x42a   :  { %401 = vst [vmem:[#allocation11 + $0x8] sm:$0xff] %v399_v4 }
 0x42b   :  { %665 = shalt.err (!%p662_p2)
}
 0x42c   :  { %s666_s28 = scalar_lea.hbm %s835_s5, 256 }
 0x42d   :  { %p667_p3 = scmp.ne.s32.totalorder %s835_s5, %s666_s28  ;;  %p670_p4 = scmp.lt.u32.totalorder %s666_s28, %s835_s5 }
 0x42f   :  { %p672_p5 = pnand %p670_p4, %p667_p3 }
 0x431   :  { %675 = shalt.err (!%p672_p5)
}
 0x432   :  { %s694_s9 = smov 128   ;;  %s695_s10 = smov 8  }
 0x433   :  { %413 = dma.vmem_to_hbm [thread:$0]  %s408_s16, 256, %s835_s5, [#allocation4], %s694_s9, %s694_s9, %s695_s10  }
 0x434   :  { %682 = dma.done.wait [#allocation4], 256  }
 0x435   :  { %683 = vsyncadd [#allocation4], 4294967040 }
 0x436   :  { %417 = vsyncpa [#allocation3], 1 }
 0x437   :  { %418 = vsyncpa [#allocation6], 1 }
 0x438   :  { %419 = vsyncpa [#allocation9], 1 }
 0x439   :  { %420 = vsyncpa [#allocation4], 1 }

</bundles_post_ra>
